<compile_context>
chip_gen: v6e
topology: v6e:2x2x1
jax: 0.10.0
libtpu: 0.0.40
codegen_flags: <defaults>
</compile_context>

<pallas_src>
import functools
import math

import jax
import jax.numpy as jnp
from jax import lax
from jax.experimental import pallas as pl
from jax.experimental.pallas import tpu as pltpu


def _sdpa_kernel(q_ref, k_ref, v_ref, out_ref, attn_ref, *, inv_scale):
    # Blocks: q (BB, TQ, D), k (BB, Lk, D), v (BB, Lk, Dv).
    # Fold 1/scale into Q; keep MXU operands in their native (possibly bf16) dtype.
    q = q_ref[...] * inv_scale
    k = k_ref[...]
    v = v_ref[...]

    # scores = Q @ K^T: contract last dims directly, batch over BB.
    s = lax.dot_general(
        q, k,
        dimension_numbers=(((2,), (2,)), ((0,), (0,))),
        preferred_element_type=jnp.float32,
    )  # (BB, TQ, Lk) f32

    # Numerically-stable softmax over the key axis (PyTorch Softmax(dim=2));
    # all elementwise math in f32.
    m = jnp.max(s, axis=-1, keepdims=True)
    e = jnp.exp(s - m)
    denom = jnp.sum(e, axis=-1, keepdims=True)
    # Reciprocal of the (BB, TQ, 1) column + broadcast multiply replaces an
    # Lq*Lk-sized divide. Exact reciprocal keeps the test tolerance tight; the
    # reciprocal itself is only BB*TQ elements so it is not on the crit path.
    attn = e * pl.reciprocal(denom, approx=False)

    # Cast probabilities once to V's dtype (bf16 MXU path when V is bf16) and
    # reuse that cast for the attention store when the dtypes agree.
    attn_lowp = attn.astype(v.dtype)
    out = lax.dot_general(
        attn_lowp, v,
        dimension_numbers=(((2,), (1,)), ((0,), (0,))),
        preferred_element_type=jnp.float32,
    )  # (BB, TQ, Dv) f32

    if attn_ref.dtype == v.dtype:
        attn_ref[...] = attn_lowp
    else:
        attn_ref[...] = attn.astype(attn_ref.dtype)
    out_ref[...] = out.astype(out_ref.dtype)
    # TODO(synk): training-mode dropout (p=0.1) not applied (eval semantics);
    # would need pltpu.prng_seed / pltpu.prng_random_bits + mask.


def _choose_tiles(B, Lq, Lk, D, Dv):
    """Pick (batch-block BB, query-tile TQ) sizes that bound per-step VMEM."""
    # Cap the (TQ, Lk) f32 score/attention tile at ~2 MiB so the per-step
    # working set (double-buffered blocks + f32 softmax temporaries) stays
    # well under the scoped-VMEM budget on every generation (incl. v7x's
    # 64 MiB physical per TensorCore).
    max_tq = max(8, ((2 * 1024 * 1024) // (4 * max(Lk, 1))) // 8 * 8)
    TQ = min(Lq, 512, max_tq)
    if TQ < Lq:
        # When actually tiling Lq, the tile must be a multiple of 8 (sublane
        # constraint); a full-dim block is always legal.
        TQ = max(8, (TQ // 8) * 8)
    # Pack several batch elements per grid step when blocks are small: fills
    # sublanes / the MXU and amortizes the fixed per-step overhead.
    per_b = 4 * (TQ * Lk + TQ * D + Lk * D + Lk * Dv + TQ * Dv)
    BB = max(1, min(B, (4 * 1024 * 1024) // max(per_b, 1)))
    return BB, TQ


def scaled_dot_product_attention(q, k, v, scale, *, attn_dtype=None):
    """q: [B, Lq, D], k: [B, Lk, D], v: [B, Lk, Dv] -> (output, attention)."""
    B, Lq, D = q.shape
    Bk, Lk, Dk = k.shape
    Bv, Lv, Dv = v.shape
    assert D == Dk and Bk == B and Bv == B and Lv == Lk

    inv_scale = 1.0 / float(scale)
    attn_dtype = q.dtype if attn_dtype is None else attn_dtype

    BB, TQ = _choose_tiles(B, Lq, Lk, D, Dv)
    grid = (pl.cdiv(B, BB), pl.cdiv(Lq, TQ))

    kernel = functools.partial(_sdpa_kernel, inv_scale=inv_scale)

    out_shapes = (
        jax.ShapeDtypeStruct((B, Lq, Dv), q.dtype),     # output
        jax.ShapeDtypeStruct((B, Lq, Lk), attn_dtype),  # attention
    )

    return pl.pallas_call(
        kernel,
        out_shape=out_shapes,
        grid_spec=pltpu.PrefetchScalarGridSpec(
            num_scalar_prefetch=0,
            grid=grid,
            in_specs=[
                # Q is tiled along Lq; K/V depend only on the batch block, so
                # they are only re-DMA'd when the batch block changes (Lq is
                # the fastest-varying grid axis).
                pl.BlockSpec((BB, TQ, D), lambda b, i: (b, i, 0)),
                pl.BlockSpec((BB, Lk, D), lambda b, i: (b, 0, 0)),
                pl.BlockSpec((BB, Lk, Dv), lambda b, i: (b, 0, 0)),
            ],
            out_specs=[
                pl.BlockSpec((BB, TQ, Dv), lambda b, i: (b, i, 0)),
                pl.BlockSpec((BB, TQ, Lk), lambda b, i: (b, i, 0)),
            ],
        ),
        compiler_params=pltpu.CompilerParams(
            # No reduction axis: every (batch-block, q-tile) step is
            # independent, so both axes can be sharded across TensorCores.
            dimension_semantics=("parallel", "parallel"),
            vmem_limit_bytes=48 * 1024 * 1024,
        ),
    )(q, k, v)


def _reference(q, k, v, scale):
    s = jnp.einsum("bqd,bkd->bqk", q, k) / scale
    attn = jax.nn.softmax(s, axis=2)
    out = jnp.einsum("bqk,bkd->bqd", attn, v)
    return out, attn


if __name__ == "__main__":
    key = jax.random.PRNGKey(0)
    kq, kk, kv = jax.random.split(key, 3)

    B, Lq, Lk, D, Dv = 2, 8, 8, 32, 32
    q = jax.random.normal(kq, (B, Lq, D), dtype=jnp.float32)
    k = jax.random.normal(kk, (B, Lk, D), dtype=jnp.float32)
    v = jax.random.normal(kv, (B, Lk, Dv), dtype=jnp.float32)
    scale = math.sqrt(D)  # paper: sqrt(dim_K)

    out, attn = scaled_dot_product_attention(q, k, v, scale)
    out = jax.block_until_ready(out)
    attn = jax.block_until_ready(attn)

    ref_out, ref_attn = _reference(q, k, v, scale)
    assert out.shape == (B, Lq, Dv)
    assert attn.shape == (B, Lq, Lk)
    assert jnp.allclose(out, ref_out, atol=1e-4, rtol=1e-4)
    assert jnp.allclose(attn, ref_attn, atol=1e-4, rtol=1e-4)

    print("KERNEL_OK")
</pallas_src>

<mosaic_0001>
module attributes {stable_mosaic.version = 11 : i64} {
  func.func @_sdpa_kernel(%arg0: i32, %arg1: i32, %arg2: memref<2x8x32xf32, #tpu.memory_space<vmem>>, %arg3: memref<2x8x32xf32, #tpu.memory_space<vmem>>, %arg4: memref<2x8x32xf32, #tpu.memory_space<vmem>>, %arg5: memref<2x8x32xf32, #tpu.memory_space<vmem>>, %arg6: memref<2x8x8xf32, #tpu.memory_space<vmem>>) attributes {dimension_semantics = [#tpu.dimension_semantics<parallel>, #tpu.dimension_semantics<parallel>], iteration_bounds = array<i64: 1, 1>, scalar_prefetch = 0 : i64, scratch_operands = 0 : i64, tpu.core_type = #tpu.core_type<tc>, window_params = [{transform_indices = @transform_0, window_bounds = array<i64: 2, 8, 32>}, {transform_indices = @transform_1, window_bounds = array<i64: 2, 8, 32>}, {transform_indices = @transform_2, window_bounds = array<i64: 2, 8, 32>}, {transform_indices = @transform_3, window_bounds = array<i64: 2, 8, 32>}, {transform_indices = @transform_4, window_bounds = array<i64: 2, 8, 8>}]} {
    %c0 = arith.constant 0 : index
    %c0_0 = arith.constant 0 : index
    %c0_1 = arith.constant 0 : index
    %0 = vector.load %arg2[%c0, %c0_0, %c0_1] : memref<2x8x32xf32, #tpu.memory_space<vmem>>, vector<2x8x32xf32>
    %cst = arith.constant 0.176776692 : f32
    %1 = vector.broadcast %cst : f32 to vector<2x8x32xf32>
    %2 = arith.mulf %0, %1 : vector<2x8x32xf32>
    %c0_2 = arith.constant 0 : index
    %c0_3 = arith.constant 0 : index
    %c0_4 = arith.constant 0 : index
    %3 = vector.load %arg3[%c0_2, %c0_3, %c0_4] : memref<2x8x32xf32, #tpu.memory_space<vmem>>, vector<2x8x32xf32>
    %c0_5 = arith.constant 0 : index
    %c0_6 = arith.constant 0 : index
    %c0_7 = arith.constant 0 : index
    %4 = vector.load %arg4[%c0_5, %c0_6, %c0_7] : memref<2x8x32xf32, #tpu.memory_space<vmem>>, vector<2x8x32xf32>
    %cst_8 = arith.constant dense<0.000000e+00> : vector<2x8x8xf32>
    %5 = tpu.matmul %2, %3, %cst_8 {dimension_numbers = #tpu.dot_dimension_numbers<[2], [2], [1], [1], [0, 0, 0, 1, 1, 1], [0], [0]>} : vector<2x8x32xf32>, vector<2x8x32xf32>, vector<2x8x8xf32> -> vector<2x8x8xf32>
    %cst_9 = arith.constant dense<0xFF800000> : vector<2x8xf32>
    %6 = vector.multi_reduction <maximumf>, %5, %cst_9 [2] : vector<2x8x8xf32> to vector<2x8xf32>
    %7 = vector.shape_cast %6 : vector<2x8xf32> to vector<2x8x1xf32>
    %8 = vector.broadcast %7 : vector<2x8x1xf32> to vector<2x8x8xf32>
    %9 = arith.subf %5, %8 : vector<2x8x8xf32>
    %10 = math.exp %9 : vector<2x8x8xf32>
    %cst_10 = arith.constant dense<0.000000e+00> : vector<2x8xf32>
    %11 = vector.multi_reduction <add>, %10, %cst_10 [2] : vector<2x8x8xf32> to vector<2x8xf32>
    %12 = vector.shape_cast %11 : vector<2x8xf32> to vector<2x8x1xf32>
    %13 = tpu.reciprocal %12 : vector<2x8x1xf32> -> vector<2x8x1xf32>
    %14 = vector.broadcast %13 : vector<2x8x1xf32> to vector<2x8x8xf32>
    %15 = arith.mulf %10, %14 : vector<2x8x8xf32>
    %cst_11 = arith.constant dense<0.000000e+00> : vector<2x8x32xf32>
    %16 = tpu.matmul %15, %4, %cst_11 {dimension_numbers = #tpu.dot_dimension_numbers<[2], [1], [1], [2], [0, 0, 0, 1, 1, 2], [0], [0]>} : vector<2x8x8xf32>, vector<2x8x32xf32>, vector<2x8x32xf32> -> vector<2x8x32xf32>
    %c0_12 = arith.constant 0 : index
    %c0_13 = arith.constant 0 : index
    %c0_14 = arith.constant 0 : index
    %17 = vector.load %arg6[%c0_12, %c0_13, %c0_14] : memref<2x8x8xf32, #tpu.memory_space<vmem>>, vector<2x8x8xf32>
    tpu.vector_store %arg6[%c0_12, %c0_13, %c0_14], %15 {strides = array<i32>} : memref<2x8x8xf32, #tpu.memory_space<vmem>>, vector<2x8x8xf32>,
    %c0_15 = arith.constant 0 : index
    %c0_16 = arith.constant 0 : index
    %c0_17 = arith.constant 0 : index
    %18 = vector.load %arg5[%c0_15, %c0_16, %c0_17] : memref<2x8x32xf32, #tpu.memory_space<vmem>>, vector<2x8x32xf32>
    tpu.vector_store %arg5[%c0_15, %c0_16, %c0_17], %16 {strides = array<i32>} : memref<2x8x32xf32, #tpu.memory_space<vmem>>, vector<2x8x32xf32>,
    return
  }
  func.func @transform_0(%arg0: i32, %arg1: i32) -> (i32, i32, i32) {
    %c0_i32 = arith.constant 0 : i32
    %c0_i32_0 = arith.constant 0 : i32
    return %arg0, %arg1, %c0_i32 : i32, i32, i32
  }
  func.func @transform_1(%arg0: i32, %arg1: i32) -> (i32, i32, i32) {
    %c0_i32 = arith.constant 0 : i32
    %c0_i32_0 = arith.constant 0 : i32
    %c0_i32_1 = arith.constant 0 : i32
    return %arg0, %c0_i32, %c0_i32_0 : i32, i32, i32
  }
  func.func @transform_2(%arg0: i32, %arg1: i32) -> (i32, i32, i32) {
    %c0_i32 = arith.constant 0 : i32
    %c0_i32_0 = arith.constant 0 : i32
    %c0_i32_1 = arith.constant 0 : i32
    return %arg0, %c0_i32, %c0_i32_0 : i32, i32, i32
  }
  func.func @transform_3(%arg0: i32, %arg1: i32) -> (i32, i32, i32) {
    %c0_i32 = arith.constant 0 : i32
    %c0_i32_0 = arith.constant 0 : i32
    return %arg0, %arg1, %c0_i32 : i32, i32, i32
  }
  func.func @transform_4(%arg0: i32, %arg1: i32) -> (i32, i32, i32) {
    %c0_i32 = arith.constant 0 : i32
    %c0_i32_0 = arith.constant 0 : i32
    return %arg0, %arg1, %c0_i32 : i32, i32, i32
  }
}

</mosaic_0001>

<bundles_post_ra>
// kernel: tpu_custom_call.1
= control target key start
LH: loop header
LB: loop body
LE: loop exit
PB: predicated region body
PF: predicated region fallthrough
CT: control target
= control target key end

     0   :  { %10 = vsyncpa [#allocation3], 0  ;;  %s668_s0 = inlined_call_operand.hbm [shape: f32[2,8,32], index: 0, kind: input, shape index: {}]   ;;  %s669_s1 = inlined_call_operand.hbm [shape: f32[2,8,32], index: 1, kind: input, shape index: {}]   ;;  %s670_s2 = inlined_call_operand.hbm [shape: f32[2,8,32], index: 2, kind: input, shape index: {}]   ;;  %s671_s3 = inlined_call_operand.hbm [shape: f32[2,8,32], index: 3, kind: output, shape index: {0}]   ;;  %s672_s4 = inlined_call_operand.hbm [shape: f32[2,8,8], index: 4, kind: output, shape index: {1}]  }
   0x1   :  { %11 = vsyncpa [#allocation6], 0 }
   0x2   :  { %12 = vsyncpa [#allocation4], 0 }
   0x3   :  { %13 = vsyncpa [#allocation10], 0  ;;  %s586_s15 = smov [#allocation5]   ;;  %s587_s17 = smov [#allocation2]  }
   0x4   :  { %s31_s16 = sshll.u32 %s586_s15, 4  ;;  %s19_s18 = sshll.u32 %s587_s17, 4  ;;  %s32_s16 = int_to_ptr.vmem [resolvable:$true] %s31_s16  ;;  %s20_s18 = int_to_ptr.vmem [resolvable:$true] %s19_s18 }
   0x5   :  { %s486_s19 = scalar_lea.vmem %s32_s16, 256  ;;  %p491_p1 = scmp.lt.s32.totalorder %s32_s16, %s32_s16 }
   0x6   :  { %p487_p0 = scmp.ne.s32.totalorder %s32_s16, %s486_s19  ;;  %p492_p2 = scmp.lt.s32.totalorder %s486_s19, %s486_s19 }
   0x8   :  { %p493_p3 = por %p492_p2, %p491_p1 }
   0xa   :  { %p494_p4 = pnand %p493_p3, %p487_p0 }
   0xc   :  { %497 = shalt.err (!%p494_p4)
}
   0xd   :  { %s588_s20 = smov 128   ;;  %s589_s21 = smov 8  }
   0xe   :  { %37 = dma.hbm_to_vmem [thread:$0]  %s669_s1, 256, %s32_s16, [#allocation6], %s588_s20, %s588_s20, %s589_s21  }
   0xf   :  { %s506_s24 = scalar_lea.vmem %s20_s18, 256  ;;  %p511_p6 = scmp.lt.s32.totalorder %s20_s18, %s20_s18 }
  0x10   :  { %p507_p5 = scmp.ne.s32.totalorder %s20_s18, %s506_s24  ;;  %p512_p7 = scmp.lt.s32.totalorder %s506_s24, %s506_s24 }
  0x12   :  { %p513_p8 = por %p512_p7, %p511_p6 }
  0x14   :  { %p514_p9 = pnand %p513_p8, %p507_p5 }
  0x16   :  { %517 = shalt.err (!%p514_p9)
}
  0x17   :  { %25 = dma.hbm_to_vmem [thread:$0]  %s668_s0, 256, %s20_s18, [#allocation3], %s588_s20, %s588_s20, %s589_s21  }
  0x18   :  { %s590_s27 = smov [#allocation7]  }
  0x19   :  { %s43_s28 = sshll.u32 %s590_s27, 4  ;;  %s44_s28 = int_to_ptr.vmem [resolvable:$true] %s43_s28 }
  0x1a   :  { %s526_s29 = scalar_lea.vmem %s44_s28, 256  ;;  %p531_p11 = scmp.lt.s32.totalorder %s44_s28, %s44_s28 }
  0x1b   :  { %p527_p10 = scmp.ne.s32.totalorder %s44_s28, %s526_s29  ;;  %p532_p12 = scmp.lt.s32.totalorder %s526_s29, %s526_s29 }
  0x1d   :  { %p533_p13 = por %p532_p12, %p531_p11 }
  0x1f   :  { %p534_p0 = pnand %p533_p13, %p527_p10 }
  0x21   :  { %537 = shalt.err (!%p534_p0)
}
  0x22   :  { %49 = dma.hbm_to_vmem [thread:$0]  %s670_s2, 256, %s44_s28, [#allocation6], %s588_s20, %s588_s20, %s589_s21  }
  0x23   :  { %578 = dma.done.wait [#allocation3], 256  }
  0x24   :  { %579 = vsyncadd [#allocation3], 4294967040 }
  0x25   :  { %580 = dma.done.wait [#allocation6], 512  }
  0x26   :  { %581 = vsyncadd [#allocation6], 4294966784  ;;  %v591_v0 = vmov 0.0   ;;  %vm592_vm0 = vmmov 0   ;;  %vm67_vm1 = vcmask 261120   ;;  %v63_v1 = vld [vmem:[#allocation5] sm:$0xff] }
  0x27   :  { %441 = vmatprep.subr.mxu0 %v591_v0  ;;  %446 = vmatprep.subr.mxu1 %v591_v0  ;;  %v64_v2 = vld [vmem:[#allocation5 + $0x8] sm:$0xff]  ;;  %v59_v3 = vld [vmem:[#allocation2] sm:$0xff]  ;;  %v60_v5 = vld [vmem:[#allocation2 + $0x8] sm:$0xff]  ;;  %vm220_vm2 = vcmask 64512   ;;  %s593_s0 = smov [#allocation9]  }
  0x28   :  { %443 = vmatprep.mubr.msk.f32.mxu0 %vm592_vm0, %v591_v0  ;;  %448 = vmatprep.mubr.msk.f32.mxu1 %vm592_vm0, %v591_v0  ;;  %v61_v4 = vmul.f32 0.17677669, %v59_v3  ;;  %v62_v6 = vmul.f32 0.17677669, %v60_v5  ;;  %v65_v23 = vld [vmem:[#allocation7] sm:$0xff]  ;;  %v66_v24 = vld [vmem:[#allocation7 + $0x8] sm:$0xff] }
  0x29   :  { %442 = vmatpush3.xpose.msk.msra.mxu0 %vm67_vm1, %v63_v1  ;;  %447 = vmatpush3.xpose.msk.msra.mxu1 %vm67_vm1, %v64_v2  ;;  %s410_s2 = sshll.u32 %s593_s0, 4  ;;  %s411_s2 = int_to_ptr.vmem [resolvable:$true] %s410_s2 }
  0x2a   :  { %451 = vmatprep.subr.mxu0 %v591_v0  ;;  %456 = vmatprep.subr.mxu1 %v591_v0  ;;  %s538_s5 = scalar_lea.vmem %s411_s2, 256  ;;  %p543_p2 = scmp.lt.s32.totalorder %s411_s2, %s411_s2 }
  0x2b   :  { %p539_p1 = scmp.ne.s32.totalorder %s411_s2, %s538_s5  ;;  %p544_p3 = scmp.lt.s32.totalorder %s538_s5, %s538_s5 }
  0x2c   :  { %444 = vmatmul.mubr.msk.f32.vlgmr.msra.gmra.mxu0 %vm67_vm1, %v61_v4  ;;  %449 = vmatmul.mubr.msk.f32.vlgmr.msra.gmra.mxu1 %vm67_vm1, %v62_v6 }
  0x2d   :  { %453 = vmatprep.mubr.msk.f32.mxu0 %vm592_vm0, %v591_v0  ;;  %458 = vmatprep.mubr.msk.f32.mxu1 %vm592_vm0, %v591_v0  ;;  %p545_p4 = por %p544_p3, %p543_p2 }
  0x2e   :  { %452 = vmatpush3.msra.mxu0 %v65_v23  ;;  %457 = vmatpush3.msra.mxu1 %v66_v24 }
  0x2f   :  { %p546_p5 = pnand %p545_p4, %p539_p1 }
  0xec   :  { %v140_v7 = vpop.f32.mrf.mxu0  ;;  %v216_v8 = vpop.f32.mrf.mxu1 }
  0xed   :  { %v221_v9 = vsel %vm220_vm2, %v140_v7, -inf  ;;  %v224_v12 = vsel %vm220_vm2, %v216_v8, -inf }
  0xee   :  { %222 = vmax.xlane.f32.xlu0 %v221_v9  ;;  %v445_v10 = vpop.f32.mrf.mxu0  ;;  %v450_v11 = vpop.f32.mrf.mxu1 }
  0xf2   :  { %225 = vmax.xlane.f32.xlu0 %v224_v12 }
 0x177   :  { %v223_v13 = vpop.xlane.xlu0 %222 }
 0x178   :  { %v227_v14 = vsub.f32 %v140_v7, %v223_v13 }
 0x17a   :  { %v229_v15 = vmul.f32 1.442695, %v227_v14 }
 0x17b   :  { %v226_v16 = vpop.xlane.xlu0 %225 }
 0x17c   :  { %470 = vpow2.f32 %v229_v15  ;;  %v228_v17 = vsub.f32 %v216_v8, %v226_v16 }
 0x17e   :  { %v231_v18 = vmul.f32 1.442695, %v228_v17 }
 0x180   :  { %472 = vpow2.f32 %v231_v18 }
 0x189   :  { %v471_v19 = vpop.eup %470 }
 0x18a   :  { %v233_v20 = vsel %vm220_vm2, %v471_v19, 0.0 }
 0x18b   :  { %234 = vadd.xlane.f32.xlu1 %v233_v20 }
 0x18d   :  { %v473_v21 = vpop.eup %472 }
 0x18e   :  { %v236_v22 = vsel %vm220_vm2, %v473_v21, 0.0 }
 0x18f   :  { %237 = vadd.xlane.f32.xlu1 %v236_v22 }
 0x214   :  { %v235_v25 = vpop.xlane.xlu1 %234 }
 0x215   :  { %474 = vrcp.f32 %v235_v25 }
 0x218   :  { %v238_v26 = vpop.xlane.xlu1 %237 }
 0x219   :  { %476 = vrcp.f32 %v238_v26 }
 0x222   :  { %v475_v27 = vpop.eup %474 }
 0x223   :  { %v241_v28 = vmul.f32 %v475_v27, %v471_v19 }
 0x225   :  { %454 = vmatmul.mubr.msk.f32.vlgmr.msra.gmra.mxu0 %vm220_vm2, %v241_v28  ;;  %389 = vst.msk [vmem:[#allocation9] sm:$0xff] %vm220_vm2, %v241_v28 }
 0x226   :  { %v477_v29 = vpop.eup %476 }
 0x227   :  { %v242_v30 = vmul.f32 %v477_v29, %v473_v21 }
 0x229   :  { %459 = vmatmul.mubr.msk.f32.vlgmr.msra.gmra.mxu1 %vm220_vm2, %v242_v30  ;;  %390 = vst.msk [vmem:[#allocation9 + $0x8] sm:$0xff] %vm220_vm2, %v242_v30 }
 0x22a   :  { %549 = shalt.err (!%p546_p5)
}
 0x22b   :  { %416 = dma.vmem_to_hbm [thread:$0]  %s411_s2, 256, %s672_s4, [#allocation10], %s588_s20, %s588_s20, %s589_s21  }
 0x22c   :  { %s594_s8 = smov [#allocation8]  }
 0x22d   :  { %s398_s9 = sshll.u32 %s594_s8, 4  ;;  %s399_s9 = int_to_ptr.vmem [resolvable:$true] %s398_s9 }
 0x22e   :  { %s558_s10 = scalar_lea.vmem %s399_s9, 256  ;;  %p563_p7 = scmp.lt.s32.totalorder %s399_s9, %s399_s9 }
 0x22f   :  { %p559_p6 = scmp.ne.s32.totalorder %s399_s9, %s558_s10  ;;  %p564_p8 = scmp.lt.s32.totalorder %s558_s10, %s558_s10 }
 0x231   :  { %p565_p9 = por %p564_p8, %p563_p7 }
 0x233   :  { %p566_p10 = pnand %p565_p9, %p559_p6 }
 0x2e5   :  { %v312_v31 = vpop.f32.mrf.mxu0 }
 0x2e6   :  { %391 = vst.msk [vmem:[#allocation8] sm:$0xff] %vm67_vm1, %v312_v31 }
 0x2e7   :  { %v455_v32 = vpop.f32.mrf.mxu0 }
 0x2e9   :  { %v385_v33 = vpop.f32.mrf.mxu1 }
 0x2ea   :  { %392 = vst.msk [vmem:[#allocation8 + $0x8] sm:$0xff] %vm67_vm1, %v385_v33 }
 0x2eb   :  { %v460_v34 = vpop.f32.mrf.mxu1 }
 0x2ec   :  { %569 = shalt.err (!%p566_p10)
}
 0x2ed   :  { %404 = dma.vmem_to_hbm [thread:$0]  %s399_s9, 256, %s671_s3, [#allocation4], %s588_s20, %s588_s20, %s589_s21  }
 0x2ee   :  { %582 = dma.done.wait [#allocation4], 256  }
 0x2ef   :  { %583 = vsyncadd [#allocation4], 4294967040 }
 0x2f0   :  { %584 = dma.done.wait [#allocation10], 256  }
 0x2f1   :  { %585 = vsyncadd [#allocation10], 4294967040 }
 0x2f2   :  { %423 = vsyncpa [#allocation3], 1 }
 0x2f3   :  { %424 = vsyncpa [#allocation6], 1 }
 0x2f4   :  { %425 = vsyncpa [#allocation4], 1 }
 0x2f5   :  { %426 = vsyncpa [#allocation10], 1 }

</bundles_post_ra>
